<compile_context>
chip_gen: v5e
topology: v5e:2x2
jax: 0.10.0
libtpu: 0.0.40
codegen_flags: <defaults>
</compile_context>

<pallas_src>
import functools

import jax
import jax.numpy as jnp
from jax.experimental import pallas as pl
from jax.experimental.pallas import tpu as pltpu


def _round_up(x: int, m: int) -> int:
    return ((x + m - 1) // m) * m


def _sublane_multiple(dtype) -> int:
    # Second-minor block dim must be a multiple of 8 (4-byte), 16 (2-byte),
    # 32 (1-byte) for the array's native tiling.
    itemsize = jnp.dtype(dtype).itemsize
    return 8 * max(1, 4 // itemsize)


def _lora_kernel(alpha_ref, x_ref, a_ref, b_ref, o_ref, xa_ref, *,
                 compute_dtype):
    # alpha_ref: SMEM scalar (scalar prefetch)
    # x_ref: (tm, in_dim), a_ref: (in_dim, rank), b_ref: (rank, tn)
    # xa_ref: persistent VMEM scratch (tm, rank) in compute_dtype.

    # Recompute the rank-sized intermediate only when the row tile changes
    # (j == 0); every other j step reuses the cached value.
    @pl.when(pl.program_id(1) == 0)
    def _():
        x = x_ref[...].astype(compute_dtype)
        a = a_ref[...].astype(compute_dtype)
        xa = jnp.dot(x, a, preferred_element_type=jnp.float32)
        # Fold alpha into the (tm, rank) intermediate (cheap VPU work) and
        # cast once to the MXU input dtype.
        xa_ref[...] = (alpha_ref[0] * xa).astype(xa_ref.dtype)

    out = jnp.dot(xa_ref[...], b_ref[...].astype(compute_dtype),
                  preferred_element_type=jnp.float32)
    o_ref[...] = out.astype(o_ref.dtype)


def _default_vmem_limit_bytes() -> int:
    # ~75% of physical VMEM (96 MiB on v5e/v6e, 48 MiB on v7x); the fallback
    # is v7x-safe.
    try:
        return int(pltpu.get_tpu_info().vmem_capacity_bytes * 3 // 4)
    except Exception:
        return 48 << 20


def lora_forward(x, A, B, alpha, *, tm=512, tn=2048,
                 compute_dtype=jnp.bfloat16, out_dtype=None,
                 vmem_limit_bytes=None):
    """Computes alpha * (x @ A @ B) with a single fused Pallas TPU kernel.

    Keep x/A/B (and out_dtype) in bf16 at rest upstream for the mem-bound
    regime on v5e/v6e; the kernel casts to `compute_dtype` only if needed.
    """
    M, in_dim = x.shape
    rank, out_dim = B.shape
    assert A.shape == (in_dim, rank), (A.shape, in_dim, rank)
    if out_dtype is None:
        out_dtype = x.dtype

    # Sublane multiple must satisfy the input array, the output array AND the
    # compute dtype (the xa scratch shares tm).
    sub = max(_sublane_multiple(x.dtype), _sublane_multiple(out_dtype),
              _sublane_multiple(compute_dtype))

    # N tile: lane-dense (multiple of 128), clamped for small out_dim.
    tn_eff = _round_up(min(tn, _round_up(out_dim, 128)), 128)
    Np = _round_up(out_dim, tn_eff)
    grid_j = Np // tn_eff

    if vmem_limit_bytes is None:
        vmem_limit_bytes = _default_vmem_limit_bytes()
    budget = int(vmem_limit_bytes * 0.9)

    x_isz = jnp.dtype(x.dtype).itemsize
    a_isz = jnp.dtype(A.dtype).itemsize
    b_isz = jnp.dtype(B.dtype).itemsize
    o_isz = jnp.dtype(out_dtype).itemsize
    c_isz = jnp.dtype(compute_dtype).itemsize

    # Deeper x buffering only pays off when there are several j steps per i.
    x_bufs = 3 if grid_j >= 3 else 2
    fixed_bytes = 2 * in_dim * rank * a_isz + 2 * rank * tn_eff * b_isz

    def vmem_need(tm_):
        return (fixed_bytes
                + x_bufs * tm_ * in_dim * x_isz      # x pipeline buffers
                + 2 * tm_ * tn_eff * o_isz           # output double buffer
                + tm_ * rank * c_isz)                # xa scratch

    # M tile: as large as requested, then shrunk until it fits VMEM.
    tm_eff = _round_up(min(tm, _round_up(M, sub)), sub)
    while tm_eff > sub and vmem_need(tm_eff) > budget:
        tm_eff = max(sub, _round_up(tm_eff // 2, sub))

    Mp = _round_up(M, tm_eff)
    # With j "arbitrary", only i is sharded across v7x's 2 TensorCores: make
    # sure reasonably large problems expose at least 2 i-tiles.
    if Mp // tm_eff == 1 and M > 512:
        tm_eff = _round_up(-(-M // 2), sub)
        Mp = _round_up(M, tm_eff)

    # Zero-pad (zero rows/cols contribute nothing; sliced off afterwards).
    xp = x if Mp == M else jnp.pad(x, ((0, Mp - M), (0, 0)))
    Bp = B if Np == out_dim else jnp.pad(B, ((0, 0), (0, Np - out_dim)))

    alpha_arr = jnp.full((1,), alpha, dtype=jnp.float32)

    kernel = functools.partial(_lora_kernel, compute_dtype=compute_dtype)

    grid = (Mp // tm_eff, grid_j)  # j (out_dim) is fastest-varying

    # x tile: constant in j -> stays resident across the N sweep (and is only
    # read at j == 0 thanks to the xa cache).
    x_index = lambda i, j, alpha_ref: (i, 0)
    if x_bufs > 2:
        x_spec = pl.BlockSpec((tm_eff, in_dim), x_index,
                              pipeline_mode=pl.Buffered(x_bufs))
    else:
        x_spec = pl.BlockSpec((tm_eff, in_dim), x_index)

    flops = 2 * M * rank * (in_dim + out_dim)
    bytes_accessed = (M * in_dim * x_isz + in_dim * rank * a_isz
                      + rank * out_dim * b_isz + M * out_dim * o_isz)
    cost = pl.CostEstimate(flops=flops, transcendentals=0,
                           bytes_accessed=bytes_accessed)

    out = pl.pallas_call(
        kernel,
        out_shape=jax.ShapeDtypeStruct((Mp, Np), out_dtype),
        grid_spec=pltpu.PrefetchScalarGridSpec(
            num_scalar_prefetch=1,
            grid=grid,
            in_specs=[
                x_spec,
                # A: fully resident.
                pl.BlockSpec((in_dim, rank), lambda i, j, alpha_ref: (0, 0)),
                # B: tiled over out_dim.
                pl.BlockSpec((rank, tn_eff), lambda i, j, alpha_ref: (0, j)),
            ],
            out_specs=pl.BlockSpec((tm_eff, tn_eff),
                                   lambda i, j, alpha_ref: (i, j)),
            scratch_shapes=[pltpu.VMEM((tm_eff, rank), compute_dtype)],
        ),
        compiler_params=pltpu.CompilerParams(
            dimension_semantics=("parallel", "arbitrary"),
            vmem_limit_bytes=vmem_limit_bytes,
        ),
        cost_estimate=cost,
    )(alpha_arr, xp, A, Bp)

    if Mp != M or Np != out_dim:
        out = out[:M, :out_dim]
    return out


def _ref_lora(x, A, B, alpha):
    # High-precision f32 reference (avoids XLA's default reduced-precision
    # f32 matmul on TPU).
    hp = jax.lax.Precision.HIGHEST
    xa = jnp.dot(x.astype(jnp.float32), A.astype(jnp.float32), precision=hp)
    return alpha * jnp.dot(xa, B.astype(jnp.float32), precision=hp)


if __name__ == "__main__":
    key = jax.random.PRNGKey(0)
    kx, ka, kb, kx2, ka2, kb2 = jax.random.split(key, 6)
    alpha = 2.0

    # ---- Test 1: tiny shapes matching the module's forward, f32 inputs ----
    M, in_dim, rank, out_dim = 8, 32, 4, 16

    x = jax.random.normal(kx, (M, in_dim), dtype=jnp.float32)
    # kaiming_uniform_(a=sqrt(5)) == uniform(-1/sqrt(fan_in), 1/sqrt(fan_in)).
    bound = 1.0 / (in_dim ** 0.5)
    A = jax.random.uniform(ka, (in_dim, rank), dtype=jnp.float32,
                           minval=-bound, maxval=bound)
    # Module inits B to zeros; use a small nonzero B so the check is
    # meaningful (shapes/semantics identical either way).
    B = 0.05 * jax.random.normal(kb, (rank, out_dim), dtype=jnp.float32)

    ref = _ref_lora(x, A, B, alpha)

    out_bf16 = jax.block_until_ready(lora_forward(x, A, B, alpha))
    assert out_bf16.shape == (M, out_dim)
    assert jnp.allclose(out_bf16, ref, rtol=5e-2, atol=1e-2), \
        "bf16-compute kernel mismatch vs reference"

    out_f32 = jax.block_until_ready(
        lora_forward(x, A, B, alpha, compute_dtype=jnp.float32))
    assert out_f32.shape == (M, out_dim)
    assert jnp.allclose(out_f32, ref, rtol=5e-4, atol=1e-5), \
        "f32-compute kernel mismatch vs reference"

    # ---- Test 2: multi-tile grid -- exercises the xa cache across the j
    # sweep, the deeper x buffering and padding/slicing, bf16 end-to-end ----
    M2, in2, r2, out2 = 160, 64, 8, 384
    x2 = jax.random.normal(kx2, (M2, in2), dtype=jnp.bfloat16)
    b2 = 1.0 / (in2 ** 0.5)
    A2 = jax.random.uniform(ka2, (in2, r2), dtype=jnp.float32,
                            minval=-b2, maxval=b2).astype(jnp.bfloat16)
    B2 = (0.05 * jax.random.normal(kb2, (r2, out2), dtype=jnp.float32)
          ).astype(jnp.bfloat16)

    ref2 = _ref_lora(x2, A2, B2, alpha)
    out2_k = jax.block_until_ready(
        lora_forward(x2, A2, B2, alpha, tm=64, tn=128))
    assert out2_k.shape == (M2, out2)
    assert jnp.allclose(out2_k.astype(jnp.float32), ref2,
                        rtol=3e-2, atol=3e-2), \
        "multi-tile bf16 kernel mismatch vs reference"

    print("KERNEL_OK")
</pallas_src>

<mosaic_0001>
module attributes {stable_mosaic.version = 11 : i64} {
  func.func @_lora_kernel(%arg0: i32, %arg1: i32, %arg2: memref<1xf32, #tpu.memory_space<smem>>, %arg3: memref<16x32xf32, #tpu.memory_space<vmem>>, %arg4: memref<32x4xf32, #tpu.memory_space<vmem>>, %arg5: memref<4x128xf32, #tpu.memory_space<vmem>>, %arg6: memref<16x128xf32, #tpu.memory_space<vmem>>, %arg7: memref<16x4xbf16, #tpu.memory_space<vmem>>) attributes {dimension_semantics = [#tpu.dimension_semantics<parallel>, #tpu.dimension_semantics<arbitrary>], iteration_bounds = array<i64: 1, 1>, scalar_prefetch = 1 : i64, scratch_operands = 1 : i64, tpu.core_type = #tpu.core_type<tc>, window_params = [{transform_indices = @transform_0, window_bounds = array<i64: 16, 32>}, {pipeline_mode = #tpu.pipeline_mode<synchronous>, transform_indices = @transform_1, window_bounds = array<i64: 32, 4>}, {transform_indices = @transform_2, window_bounds = array<i64: 4, 128>}, {transform_indices = @transform_3, window_bounds = array<i64: 16, 128>}]} {
    %c0_i32 = arith.constant 0 : i32
    %0 = arith.cmpi eq, %arg1, %c0_i32 : i32
    %1 = arith.extui %0 : i1 to i32
    %c0_i32_0 = arith.constant 0 : i32
    %2 = arith.cmpi ne, %1, %c0_i32_0 : i32
    scf.if %2 {
      %c0_6 = arith.constant 0 : index
      %c0_7 = arith.constant 0 : index
      %8 = vector.load %arg3[%c0_6, %c0_7] : memref<16x32xf32, #tpu.memory_space<vmem>>, vector<16x32xf32>
      %9 = arith.truncf %8 : vector<16x32xf32> to vector<16x32xbf16>
      %c0_8 = arith.constant 0 : index
      %c0_9 = arith.constant 0 : index
      %10 = vector.load %arg4[%c0_8, %c0_9] : memref<32x4xf32, #tpu.memory_space<vmem>>, vector<32x4xf32>
      %11 = arith.truncf %10 : vector<32x4xf32> to vector<32x4xbf16>
      %cst_10 = arith.constant dense<0.000000e+00> : vector<16x4xf32>
      %12 = tpu.matmul %9, %11, %cst_10 {dimension_numbers = #tpu.dot_dimension_numbers<[1], [0], [0], [1], [0, 0, 1, 1], [], []>} : vector<16x32xbf16>, vector<32x4xbf16>, vector<16x4xf32> -> vector<16x4xf32>
      %c0_11 = arith.constant 0 : index
      %13 = memref.load %arg2[%c0_11] : memref<1xf32, #tpu.memory_space<smem>>
      %14 = vector.broadcast %13 : f32 to vector<16x4xf32>
      %15 = arith.mulf %14, %12 : vector<16x4xf32>
      %16 = arith.truncf %15 : vector<16x4xf32> to vector<16x4xbf16>
      %c0_12 = arith.constant 0 : index
      %c0_13 = arith.constant 0 : index
      %17 = vector.load %arg7[%c0_12, %c0_13] : memref<16x4xbf16, #tpu.memory_space<vmem>>, vector<16x4xbf16>
      tpu.vector_store %arg7[%c0_12, %c0_13], %16 {strides = array<i32>} : memref<16x4xbf16, #tpu.memory_space<vmem>>, vector<16x4xbf16>,
    } else {
    }
    %c0 = arith.constant 0 : index
    %c0_1 = arith.constant 0 : index
    %3 = vector.load %arg7[%c0, %c0_1] : memref<16x4xbf16, #tpu.memory_space<vmem>>, vector<16x4xbf16>
    %c0_2 = arith.constant 0 : index
    %c0_3 = arith.constant 0 : index
    %4 = vector.load %arg5[%c0_2, %c0_3] : memref<4x128xf32, #tpu.memory_space<vmem>>, vector<4x128xf32>
    %5 = arith.truncf %4 : vector<4x128xf32> to vector<4x128xbf16>
    %cst = arith.constant dense<0.000000e+00> : vector<16x128xf32>
    %6 = tpu.matmul %3, %5, %cst {dimension_numbers = #tpu.dot_dimension_numbers<[1], [0], [0], [1], [0, 0, 1, 1], [], []>} : vector<16x4xbf16>, vector<4x128xbf16>, vector<16x128xf32> -> vector<16x128xf32>
    %c0_4 = arith.constant 0 : index
    %c0_5 = arith.constant 0 : index
    %7 = vector.load %arg6[%c0_4, %c0_5] : memref<16x128xf32, #tpu.memory_space<vmem>>, vector<16x128xf32>
    tpu.vector_store %arg6[%c0_4, %c0_5], %6 {strides = array<i32>} : memref<16x128xf32, #tpu.memory_space<vmem>>, vector<16x128xf32>,
    return
  }
  func.func @transform_0(%arg0: i32, %arg1: i32, %arg2: memref<1xf32, #tpu.memory_space<smem>>) -> (i32, i32) {
    %c0_i32 = arith.constant 0 : i32
    %c0_i32_0 = arith.constant 0 : i32
    return %arg0, %c0_i32 : i32, i32
  }
  func.func @transform_1(%arg0: i32, %arg1: i32, %arg2: memref<1xf32, #tpu.memory_space<smem>>) -> (i32, i32) {
    %c0_i32 = arith.constant 0 : i32
    %c0_i32_0 = arith.constant 0 : i32
    %c0_i32_1 = arith.constant 0 : i32
    return %c0_i32, %c0_i32_0 : i32, i32
  }
  func.func @transform_2(%arg0: i32, %arg1: i32, %arg2: memref<1xf32, #tpu.memory_space<smem>>) -> (i32, i32) {
    %c0_i32 = arith.constant 0 : i32
    %c0_i32_0 = arith.constant 0 : i32
    return %c0_i32, %arg1 : i32, i32
  }
  func.func @transform_3(%arg0: i32, %arg1: i32, %arg2: memref<1xf32, #tpu.memory_space<smem>>) -> (i32, i32) {
    %c0_i32 = arith.constant 0 : i32
    return %arg0, %arg1 : i32, i32
  }
}

</mosaic_0001>

<bundles_post_ra>
// kernel: tpu_custom_call.1
= control target key start
LH: loop header
LB: loop body
LE: loop exit
PB: predicated region body
PF: predicated region fallthrough
CT: control target
= control target key end

     0   :  { %s200_s0 = inlined_call_operand.<no memory space> [shape: f32[1], index: 0, kind: input, shape index: {}]   ;;  %s201_s1 = inlined_call_operand.vmem [shape: f32[16,32], index: 1, kind: input, shape index: {}]   ;;  %s202_s2 = inlined_call_operand.vmem [shape: f32[32,4], index: 2, kind: input, shape index: {}]   ;;  %s203_s3 = inlined_call_operand.vmem [shape: f32[4,128], index: 3, kind: input, shape index: {}]   ;;  %s204_s4 = inlined_call_operand.hbm [shape: f32[16,128], index: 4, kind: output, shape index: {}]  }
   0x1   :  { %v27_v0 = vld [vmem:[%s202_s2 + $0x10] sm:$0xff]  ;;  %v28_v1 = vld [vmem:[%s202_s2 + $0x18] sm:$0xff]  ;;  %v25_v2 = vld [vmem:[%s202_s2] sm:$0xff] }
   0x2   :  { %v30_v3 = vpack.c.bf16 %v28_v1, %v27_v0  ;;  %v26_v4 = vld [vmem:[%s202_s2 + $0x8] sm:$0xff] }
   0x3   :  { %10 = vsyncpa [#allocation6], 0  ;;  %v29_v5 = vpack.c.bf16 %v26_v4, %v25_v2  ;;  %v22_v6 = vld [vmem:[%s201_s1] sm:$0xff]  ;;  %v23_v7 = vld [vmem:[%s201_s1 + $0x8] sm:$0xff]  ;;  %vm31_vm0 = vcmask 261120   ;;  %vm71_vm1 = vcmask 1041408   ;;  %v50_v12 = vstv %s200_s0 }
   0x4   :  { %41 = vmatpush.bf16.msra.mxu0 %v30_v3  ;;  %v24_v8 = vpack.c.bf16 %v23_v7, %v22_v6  ;;  %v60_v9 = vld [vmem:[%s203_s3] sm:$0xf]  ;;  %vm55_vm2 = vcmask 27648   ;;  %vm67_vm3 = vcmask 31744   ;;  %s145_s1 = smov [#allocation5]   ;;  %s97_s0 = sshll.u32 %s204_s4, 4  ;;  %s98_s0 = int_to_ptr.hbm [resolvable:$true] %s97_s0 }
   0x5   :  { %v61_v10 = vpack.c.bf16 %v60_v9, %v60_v9  ;;  %s95_s3 = sshll.u32 %s145_s1, 4  ;;  %s146_s6 = smov 128   ;;  %s96_s3 = int_to_ptr.vmem [resolvable:$true] %s95_s3 }
   0x6   :  { %s147_s7 = smov 8  }
   0x7   :  { %v73_v11 = vsel %vm71_vm1, %v61_v10, 0 }
   0x8   :  { %42 = vmatpush.bf16.msra.mxu0 %v29_v5  ;;  %82 = vmatpush.bf16.msra.mxu1 %v73_v11 }
   0xb   :  { %109 = vmatmul.msk.bf16.vlgmr.msra.gmra.mxu0 %vm31_vm0, %v24_v8 }
  0x88   :  { %v44_v13 = vpop.f32.mrf.mxu0 }
  0x89   :  { %v51_v14 = vmul.f32 %v50_v12, %v44_v13 }
  0x8b   :  { %v53_v15 = vpack.c.bf16 %v51_v14, %v51_v14 }
  0x8d   :  { %56 = vst.msk [vmem:[#allocation2] sm:$0xf] %vm55_vm2, %v53_v15 }
  0x90   :  { %v46_v16 = vpop.f32.mrf.mxu0 }
  0x91   :  { %v52_v17 = vmul.f32 %v50_v12, %v46_v16 }
  0x93   :  { %v54_v18 = vpack.c.bf16 %v52_v17, %v52_v17 }
  0x95   :  { %57 = vst.msk [vmem:[#allocation2 + $0x4] sm:$0xf] %vm55_vm2, %v54_v18 }
  0x9c   :  { %v115_v19 = vld [vmem:[#allocation2] sm:$0xff] }
  0x9d   :  { %114 = vmatmul.msk.bf16.vlgmr.msra.gmra.mxu1 %vm67_vm3, %v115_v19 }
 0x11a   :  { %v84_v20 = vpop.f32.mrf.mxu1 }
 0x11b   :  { %89 = vst [vmem:[#allocation5] sm:$0xff] %v84_v20 }
 0x122   :  { %v86_v21 = vpop.f32.mrf.mxu1 }
 0x123   :  { %90 = vst [vmem:[#allocation5 + $0x8] sm:$0xff] %v86_v21 }
 0x124   :  { %103 = dma.vmem_to_hbm [thread:$0]  %s96_s3, 256, %s98_s0, [#allocation6], %s146_s6, %s146_s6, %s147_s7  }
 0x125   :  { %143 = dma.done.wait [#allocation6], 256  }
 0x126   :  { %144 = vsyncadd [#allocation6], 4294967040 }
 0x127   :  { %108 = vsyncpa [#allocation6], 1 }

</bundles_post_ra>
